<compile_context>
chip_gen: v7x
topology: tpu7x:2x2x1
jax: 0.10.0
libtpu: 0.0.40
codegen_flags: <defaults>
</compile_context>

<pallas_src>
import math
import functools

import jax
import jax.numpy as jnp
from jax import lax
from jax.experimental import pallas as pl
from jax.experimental.pallas import tpu as pltpu


def _mha_kernel(x_ref, wq_ref, wk_ref, wv_ref, mask_ref, o_ref,
                k_scratch, v_scratch, acc_scratch,
                *, num_heads, head_size, q_tile, scale):
    # Block views:
    #   x_ref    : (1, S, D_in)   f32   full sequence for this batch element
    #   w*_ref   : (D_in, H*hd)   bf16  fused-head projection weights (W.T)
    #   mask_ref : (1, 1, S)      f32   additive key-padding row
    #   o_ref    : (1, TQ, H*hd)        lane-dense output tile
    #   k/v_scratch : (H, S, hd)  bf16  resident head-leading K / V projections
    #   acc_scratch : (TQ, H*hd)  f32   full-width output accumulator
    H, hd = num_heads, head_size
    S = x_ref.shape[1]
    t = pl.program_id(1)

    # K / V projections: one fused bf16 matmul each, computed once per batch
    # element (scratch persists across the sequential q-tile axis), then
    # unpacked head-by-head into head-leading scratch so the inner loop never
    # slices K/V on the lane dimension.
    @pl.when(t == 0)
    def _():
        xs = x_ref[0].astype(jnp.bfloat16)                           # (S, D_in)
        kf = jnp.dot(xs, wk_ref[...], preferred_element_type=jnp.float32)
        vf = jnp.dot(xs, wv_ref[...], preferred_element_type=jnp.float32)
        for h in range(H):                                           # static unroll
            sl = slice(h * hd, (h + 1) * hd)
            k_scratch[h] = kf[:, sl].astype(jnp.bfloat16)
            v_scratch[h] = vf[:, sl].astype(jnp.bfloat16)

    # Fused-head Q projection for the current query tile (bf16 MXU, f32 acc);
    # softmax scale folded into q once (TQ*N multiplies instead of H*TQ*S).
    q_start = pl.multiple_of(t * q_tile, q_tile)
    xq = x_ref[0, pl.ds(q_start, q_tile), :].astype(jnp.bfloat16)    # (TQ, D_in)
    q = jnp.dot(xq, wq_ref[...], preferred_element_type=jnp.float32)  # (TQ, N)
    q_bf = (q * scale).astype(jnp.bfloat16)

    # Hoisted mask broadcast (JAX does not CSE broadcast_in_dim inside the
    # unrolled head loop).
    mask_b = jnp.broadcast_to(mask_ref[0], (q_tile, S))               # (TQ, S) f32

    # Contract the last dim of both operands: q @ k^T without materializing k.T
    # (no per-head XLU transpose).
    qk_dims = (((1,), (1,)), ((), ()))

    for h in range(H):                                                # static unroll
        sl = slice(h * hd, (h + 1) * hd)
        qh = q_bf[:, sl]                                              # (TQ, hd) bf16
        kh = k_scratch[h]                                             # (S, hd)  bf16
        vh = v_scratch[h]                                             # (S, hd)  bf16

        s = lax.dot_general(qh, kh, qk_dims,
                            preferred_element_type=jnp.float32)       # (TQ, S) f32
        s = s + mask_b

        # Softmax statistics in f32; probabilities cast to bf16 only for the
        # PV matmul; normalization applied after PV (cheaper, still exact math
        # up to the EUP reciprocal).
        m = jnp.max(s, axis=-1, keepdims=True)
        p = jnp.exp(s - m)
        denom = jnp.sum(p, axis=-1, keepdims=True)
        oh = jnp.dot(p.astype(jnp.bfloat16), vh,
                     preferred_element_type=jnp.float32)              # (TQ, hd) f32
        acc_scratch[:, sl] = oh * pl.reciprocal(denom, approx=True)

    # Single unmasked lane-dense store of the full-width output slab.
    o_ref[0] = acc_scratch[...].astype(o_ref.dtype)


def multi_head_attention(x, wq, wk, wv, mask, *, num_heads, head_size,
                         q_tile=None):
    """
    x        : [B, S, D_in]              float32
    wq/wk/wv : [H*head_size, D_in]       nn.Linear weight layout (bias=False)
    mask     : [B, 1, 1, S] additive key-padding mask (broadcast over heads
               and queries), or None.
    returns  : [B, S, H*head_size]  (same as the PyTorch forward)
    """
    B, S, D_in = x.shape
    H, hd = num_heads, head_size
    N = H * hd

    # VMEM capacity (v5e/v6e: 128 MiB, v7x: 64 MiB) drives the q-tile cap and
    # the scoped VMEM limit.
    try:
        vmem_cap = int(pltpu.get_tpu_info().vmem_capacity_bytes)
    except Exception:
        vmem_cap = 64 * 2**20
    q_cap = 128 if vmem_cap <= 64 * 2**20 else 256

    if q_tile is None:
        q_tile = S if S <= q_cap else q_cap
    assert S % q_tile == 0, "sequence length must be divisible by the query tile"
    n_q_tiles = S // q_tile

    # One-time parameter prep (for repeated inference, do this once at setup):
    # fused-head weights [D_in, H*hd] in bf16 (native MXU dtype, half the DMA).
    wq_t = wq.T.astype(jnp.bfloat16)
    wk_t = wk.T.astype(jnp.bfloat16)
    wv_t = wv.T.astype(jnp.bfloat16)

    # Per-key additive mask row, shape (B, 1, S) -- O(S) bytes, not O(S^2).
    if mask is None:
        mask_row = jnp.zeros((B, 1, S), dtype=jnp.float32)
    else:
        mask_row = mask.reshape(B, 1, S).astype(jnp.float32)

    scale = 1.0 / math.sqrt(hd)
    kernel = functools.partial(_mha_kernel, num_heads=H, head_size=hd,
                               q_tile=q_tile, scale=scale)

    # Explicit VMEM budget (double-buffered blocks + resident scratch, with
    # lane padding to 128), clamped to the chip's capacity with headroom.
    lane = 128
    est = (2 * S * max(D_in, lane) * 4                 # x block (f32)
           + 2 * 3 * D_in * max(N, lane) * 2           # bf16 weight blocks
           + 2 * 8 * lane * 4                          # mask row block
           + 2 * q_tile * max(N, lane) * 4             # output block
           + 2 * H * S * max(hd, lane) * 2             # bf16 K/V scratch
           + q_tile * max(N, lane) * 4)                # f32 accumulator
    vmem_limit = int(min(int(0.9 * vmem_cap), max(32 * 2**20, 2 * est)))

    out = pl.pallas_call(
        kernel,
        out_shape=jax.ShapeDtypeStruct((B, S, N), x.dtype),
        grid_spec=pltpu.PrefetchScalarGridSpec(
            num_scalar_prefetch=0,
            grid=(B, n_q_tiles),
            in_specs=[
                # x: full sequence, revisited (not re-DMA'd) across q tiles.
                pl.BlockSpec((1, S, D_in), lambda b, t: (b, 0, 0)),
                # fused-head bf16 weights: resident across the whole grid.
                pl.BlockSpec((D_in, N), lambda b, t: (0, 0)),
                pl.BlockSpec((D_in, N), lambda b, t: (0, 0)),
                pl.BlockSpec((D_in, N), lambda b, t: (0, 0)),
                # padding-row mask.
                pl.BlockSpec((1, 1, S), lambda b, t: (b, 0, 0)),
            ],
            out_specs=pl.BlockSpec((1, q_tile, N), lambda b, t: (b, t, 0)),
            scratch_shapes=[
                pltpu.VMEM((H, S, hd), jnp.bfloat16),   # K projections (head-leading)
                pltpu.VMEM((H, S, hd), jnp.bfloat16),   # V projections (head-leading)
                pltpu.VMEM((q_tile, N), jnp.float32),   # output accumulator
            ],
        ),
        compiler_params=pltpu.CompilerParams(
            # batch axis parallel (feeds both v7x TensorCores); q-tile axis
            # sequential because K/V scratch is carried across it.
            dimension_semantics=("parallel", "arbitrary"),
            vmem_limit_bytes=vmem_limit,
        ),
    )(x, wq_t, wk_t, wv_t, mask_row)

    return out


def _reference(x, wq, wk, wv, mask, *, num_heads, head_size):
    """Pure-JAX reference mirroring the PyTorch forward exactly (f32)."""
    B, S, D_in = x.shape
    H, hd = num_heads, head_size
    q = x @ wq.T
    k = x @ wk.T
    v = x @ wv.T

    def split(t):
        return jnp.transpose(t.reshape(B, S, H, hd), (0, 2, 1, 3))

    q, k, v = split(q), split(k), split(v)
    logits = jnp.einsum("bhqd,bhkd->bhqk", q, k) / math.sqrt(hd)
    if mask is not None:
        logits = logits + mask              # (B,1,1,S) broadcasts over h, q
    attn = jax.nn.softmax(logits, axis=3)
    out = jnp.einsum("bhqk,bhkd->bhqd", attn, v)
    out = jnp.transpose(out, (0, 2, 1, 3)).reshape(B, S, H * hd)
    return out


if __name__ == "__main__":
    # Small shapes consistent with the module's forward.
    B, S, D_in = 2, 8, 32
    num_heads, head_size = 4, 16
    out_dim = num_heads * head_size

    key = jax.random.PRNGKey(0)
    k1, k2, k3, k4, k5 = jax.random.split(key, 5)

    x = jax.random.normal(k1, (B, S, D_in), dtype=jnp.float32)
    # nn.Linear(inputsize, output_dim, bias=False) weights: [out_dim, D_in]
    wq = jax.random.normal(k2, (out_dim, D_in), dtype=jnp.float32) * 0.1
    wk = jax.random.normal(k3, (out_dim, D_in), dtype=jnp.float32) * 0.1
    wv = jax.random.normal(k4, (out_dim, D_in), dtype=jnp.float32) * 0.1
    # Additive key-padding mask (0 / -1e9), broadcast over heads and queries.
    mask_bits = jax.random.bernoulli(k5, p=0.2, shape=(B, 1, 1, S))
    mask = jnp.where(mask_bits, -1e9, 0.0).astype(jnp.float32)

    out = multi_head_attention(
        x, wq, wk, wv, mask, num_heads=num_heads, head_size=head_size
    )
    out = jax.block_until_ready(out)

    ref = _reference(x, wq, wk, wv, mask, num_heads=num_heads, head_size=head_size)
    assert out.shape == (B, S, out_dim)
    # Tolerance accounts for bf16 matmul inputs and the approximate (EUP)
    # softmax reciprocal; accumulation/softmax statistics stay in f32.
    assert jnp.allclose(out, ref, atol=3e-2, rtol=3e-2), (
        "mismatch vs reference: max |diff| = %g"
        % float(jnp.max(jnp.abs(out - ref))))

    print("KERNEL_OK")
</pallas_src>

<mosaic_0001>
module attributes {stable_mosaic.version = 11 : i64} {
  func.func @_mha_kernel(%arg0: i32, %arg1: i32, %arg2: memref<1x8x32xf32, #tpu.memory_space<vmem>>, %arg3: memref<32x64xbf16, #tpu.memory_space<vmem>>, %arg4: memref<32x64xbf16, #tpu.memory_space<vmem>>, %arg5: memref<32x64xbf16, #tpu.memory_space<vmem>>, %arg6: memref<1x1x8xf32, #tpu.memory_space<vmem>>, %arg7: memref<1x8x64xf32, #tpu.memory_space<vmem>>, %arg8: memref<4x8x16xbf16, #tpu.memory_space<vmem>>, %arg9: memref<4x8x16xbf16, #tpu.memory_space<vmem>>, %arg10: memref<8x64xf32, #tpu.memory_space<vmem>>) attributes {dimension_semantics = [#tpu.dimension_semantics<parallel>, #tpu.dimension_semantics<arbitrary>], iteration_bounds = array<i64: 2, 1>, scalar_prefetch = 0 : i64, scratch_operands = 3 : i64, tpu.core_type = #tpu.core_type<tc>, window_params = [{transform_indices = @transform_0, window_bounds = array<i64: 1, 8, 32>}, {pipeline_mode = #tpu.pipeline_mode<synchronous>, transform_indices = @transform_1, window_bounds = array<i64: 32, 64>}, {pipeline_mode = #tpu.pipeline_mode<synchronous>, transform_indices = @transform_2, window_bounds = array<i64: 32, 64>}, {pipeline_mode = #tpu.pipeline_mode<synchronous>, transform_indices = @transform_3, window_bounds = array<i64: 32, 64>}, {transform_indices = @transform_4, window_bounds = array<i64: 1, 1, 8>}, {transform_indices = @transform_5, window_bounds = array<i64: 1, 8, 64>}]} {
    %c0_i32 = arith.constant 0 : i32
    %0 = arith.cmpi eq, %arg1, %c0_i32 : i32
    %1 = arith.extui %0 : i1 to i32
    %c0_i32_0 = arith.constant 0 : i32
    %2 = arith.cmpi ne, %1, %c0_i32_0 : i32
    scf.if %2 {
      %c0_55 = arith.constant 0 : index
      %c0_56 = arith.constant 0 : index
      %c0_57 = arith.constant 0 : index
      %102 = vector.load %arg2[%c0_55, %c0_56, %c0_57] : memref<1x8x32xf32, #tpu.memory_space<vmem>>, vector<1x8x32xf32>
      %103 = vector.shape_cast %102 : vector<1x8x32xf32> to vector<8x32xf32>
      %104 = arith.truncf %103 : vector<8x32xf32> to vector<8x32xbf16>
      %c0_58 = arith.constant 0 : index
      %c0_59 = arith.constant 0 : index
      %105 = vector.load %arg4[%c0_58, %c0_59] : memref<32x64xbf16, #tpu.memory_space<vmem>>, vector<32x64xbf16>
      %cst_60 = arith.constant dense<0.000000e+00> : vector<8x64xf32>
      %106 = tpu.matmul %104, %105, %cst_60 {dimension_numbers = #tpu.dot_dimension_numbers<[1], [0], [0], [1], [0, 0, 1, 1], [], []>} : vector<8x32xbf16>, vector<32x64xbf16>, vector<8x64xf32> -> vector<8x64xf32>
      %c0_61 = arith.constant 0 : index
      %c0_62 = arith.constant 0 : index
      %107 = vector.load %arg5[%c0_61, %c0_62] : memref<32x64xbf16, #tpu.memory_space<vmem>>, vector<32x64xbf16>
      %cst_63 = arith.constant dense<0.000000e+00> : vector<8x64xf32>
      %108 = tpu.matmul %104, %107, %cst_63 {dimension_numbers = #tpu.dot_dimension_numbers<[1], [0], [0], [1], [0, 0, 1, 1], [], []>} : vector<8x32xbf16>, vector<32x64xbf16>, vector<8x64xf32> -> vector<8x64xf32>
      %109 = vector.extract_strided_slice %106 {offsets = [0, 0], sizes = [8, 16], strides = [1, 1]} : vector<8x64xf32> to vector<8x16xf32>
      %110 = arith.truncf %109 : vector<8x16xf32> to vector<8x16xbf16>
      %c0_64 = arith.constant 0 : index
      %c0_65 = arith.constant 0 : index
      %c0_66 = arith.constant 0 : index
      %111 = vector.load %arg8[%c0_64, %c0_65, %c0_66] : memref<4x8x16xbf16, #tpu.memory_space<vmem>>, vector<1x8x16xbf16>
      %112 = vector.shape_cast %111 : vector<1x8x16xbf16> to vector<8x16xbf16>
      %113 = vector.shape_cast %110 : vector<8x16xbf16> to vector<1x8x16xbf16>
      tpu.vector_store %arg8[%c0_64, %c0_65, %c0_66], %113 {strides = array<i32>} : memref<4x8x16xbf16, #tpu.memory_space<vmem>>, vector<1x8x16xbf16>,
      %114 = vector.extract_strided_slice %108 {offsets = [0, 0], sizes = [8, 16], strides = [1, 1]} : vector<8x64xf32> to vector<8x16xf32>
      %115 = arith.truncf %114 : vector<8x16xf32> to vector<8x16xbf16>
      %c0_67 = arith.constant 0 : index
      %c0_68 = arith.constant 0 : index
      %c0_69 = arith.constant 0 : index
      %116 = vector.load %arg9[%c0_67, %c0_68, %c0_69] : memref<4x8x16xbf16, #tpu.memory_space<vmem>>, vector<1x8x16xbf16>
      %117 = vector.shape_cast %116 : vector<1x8x16xbf16> to vector<8x16xbf16>
      %118 = vector.shape_cast %115 : vector<8x16xbf16> to vector<1x8x16xbf16>
      tpu.vector_store %arg9[%c0_67, %c0_68, %c0_69], %118 {strides = array<i32>} : memref<4x8x16xbf16, #tpu.memory_space<vmem>>, vector<1x8x16xbf16>,
      %119 = vector.extract_strided_slice %106 {offsets = [0, 16], sizes = [8, 16], strides = [1, 1]} : vector<8x64xf32> to vector<8x16xf32>
      %120 = arith.truncf %119 : vector<8x16xf32> to vector<8x16xbf16>
      %c1_70 = arith.constant 1 : index
      %c0_71 = arith.constant 0 : index
      %c0_72 = arith.constant 0 : index
      %121 = vector.load %arg8[%c1_70, %c0_71, %c0_72] : memref<4x8x16xbf16, #tpu.memory_space<vmem>>, vector<1x8x16xbf16>
      %122 = vector.shape_cast %121 : vector<1x8x16xbf16> to vector<8x16xbf16>
      %123 = vector.shape_cast %120 : vector<8x16xbf16> to vector<1x8x16xbf16>
      tpu.vector_store %arg8[%c1_70, %c0_71, %c0_72], %123 {strides = array<i32>} : memref<4x8x16xbf16, #tpu.memory_space<vmem>>, vector<1x8x16xbf16>,
      %124 = vector.extract_strided_slice %108 {offsets = [0, 16], sizes = [8, 16], strides = [1, 1]} : vector<8x64xf32> to vector<8x16xf32>
      %125 = arith.truncf %124 : vector<8x16xf32> to vector<8x16xbf16>
      %c1_73 = arith.constant 1 : index
      %c0_74 = arith.constant 0 : index
      %c0_75 = arith.constant 0 : index
      %126 = vector.load %arg9[%c1_73, %c0_74, %c0_75] : memref<4x8x16xbf16, #tpu.memory_space<vmem>>, vector<1x8x16xbf16>
      %127 = vector.shape_cast %126 : vector<1x8x16xbf16> to vector<8x16xbf16>
      %128 = vector.shape_cast %125 : vector<8x16xbf16> to vector<1x8x16xbf16>
      tpu.vector_store %arg9[%c1_73, %c0_74, %c0_75], %128 {strides = array<i32>} : memref<4x8x16xbf16, #tpu.memory_space<vmem>>, vector<1x8x16xbf16>,
      %129 = vector.extract_strided_slice %106 {offsets = [0, 32], sizes = [8, 16], strides = [1, 1]} : vector<8x64xf32> to vector<8x16xf32>
      %130 = arith.truncf %129 : vector<8x16xf32> to vector<8x16xbf16>
      %c2_76 = arith.constant 2 : index
      %c0_77 = arith.constant 0 : index
      %c0_78 = arith.constant 0 : index
      %131 = vector.load %arg8[%c2_76, %c0_77, %c0_78] : memref<4x8x16xbf16, #tpu.memory_space<vmem>>, vector<1x8x16xbf16>
      %132 = vector.shape_cast %131 : vector<1x8x16xbf16> to vector<8x16xbf16>
      %133 = vector.shape_cast %130 : vector<8x16xbf16> to vector<1x8x16xbf16>
      tpu.vector_store %arg8[%c2_76, %c0_77, %c0_78], %133 {strides = array<i32>} : memref<4x8x16xbf16, #tpu.memory_space<vmem>>, vector<1x8x16xbf16>,
      %134 = vector.extract_strided_slice %108 {offsets = [0, 32], sizes = [8, 16], strides = [1, 1]} : vector<8x64xf32> to vector<8x16xf32>
      %135 = arith.truncf %134 : vector<8x16xf32> to vector<8x16xbf16>
      %c2_79 = arith.constant 2 : index
      %c0_80 = arith.constant 0 : index
      %c0_81 = arith.constant 0 : index
      %136 = vector.load %arg9[%c2_79, %c0_80, %c0_81] : memref<4x8x16xbf16, #tpu.memory_space<vmem>>, vector<1x8x16xbf16>
      %137 = vector.shape_cast %136 : vector<1x8x16xbf16> to vector<8x16xbf16>
      %138 = vector.shape_cast %135 : vector<8x16xbf16> to vector<1x8x16xbf16>
      tpu.vector_store %arg9[%c2_79, %c0_80, %c0_81], %138 {strides = array<i32>} : memref<4x8x16xbf16, #tpu.memory_space<vmem>>, vector<1x8x16xbf16>,
      %139 = vector.extract_strided_slice %106 {offsets = [0, 48], sizes = [8, 16], strides = [1, 1]} : vector<8x64xf32> to vector<8x16xf32>
      %140 = arith.truncf %139 : vector<8x16xf32> to vector<8x16xbf16>
      %c3_82 = arith.constant 3 : index
      %c0_83 = arith.constant 0 : index
      %c0_84 = arith.constant 0 : index
      %141 = vector.load %arg8[%c3_82, %c0_83, %c0_84] : memref<4x8x16xbf16, #tpu.memory_space<vmem>>, vector<1x8x16xbf16>
      %142 = vector.shape_cast %141 : vector<1x8x16xbf16> to vector<8x16xbf16>
      %143 = vector.shape_cast %140 : vector<8x16xbf16> to vector<1x8x16xbf16>
      tpu.vector_store %arg8[%c3_82, %c0_83, %c0_84], %143 {strides = array<i32>} : memref<4x8x16xbf16, #tpu.memory_space<vmem>>, vector<1x8x16xbf16>,
      %144 = vector.extract_strided_slice %108 {offsets = [0, 48], sizes = [8, 16], strides = [1, 1]} : vector<8x64xf32> to vector<8x16xf32>
      %145 = arith.truncf %144 : vector<8x16xf32> to vector<8x16xbf16>
      %c3_85 = arith.constant 3 : index
      %c0_86 = arith.constant 0 : index
      %c0_87 = arith.constant 0 : index
      %146 = vector.load %arg9[%c3_85, %c0_86, %c0_87] : memref<4x8x16xbf16, #tpu.memory_space<vmem>>, vector<1x8x16xbf16>
      %147 = vector.shape_cast %146 : vector<1x8x16xbf16> to vector<8x16xbf16>
      %148 = vector.shape_cast %145 : vector<8x16xbf16> to vector<1x8x16xbf16>
      tpu.vector_store %arg9[%c3_85, %c0_86, %c0_87], %148 {strides = array<i32>} : memref<4x8x16xbf16, #tpu.memory_space<vmem>>, vector<1x8x16xbf16>,
    } else {
    }
    %c8_i32 = arith.constant 8 : i32
    %3 = arith.muli %arg1, %c8_i32 : i32
    %4 = tpu.assume_multiple %3, 8 : i32
    %c0 = arith.constant 0 : index
    %5 = arith.index_cast %4 : i32 to index
    %c0_1 = arith.constant 0 : index
    %6 = vector.load %arg2[%c0, %5, %c0_1] : memref<1x8x32xf32, #tpu.memory_space<vmem>>, vector<1x8x32xf32>
    %7 = vector.shape_cast %6 : vector<1x8x32xf32> to vector<8x32xf32>
    %8 = arith.truncf %7 : vector<8x32xf32> to vector<8x32xbf16>
    %c0_2 = arith.constant 0 : index
    %c0_3 = arith.constant 0 : index
    %9 = vector.load %arg3[%c0_2, %c0_3] : memref<32x64xbf16, #tpu.memory_space<vmem>>, vector<32x64xbf16>
    %cst = arith.constant dense<0.000000e+00> : vector<8x64xf32>
    %10 = tpu.matmul %8, %9, %cst {dimension_numbers = #tpu.dot_dimension_numbers<[1], [0], [0], [1], [0, 0, 1, 1], [], []>} : vector<8x32xbf16>, vector<32x64xbf16>, vector<8x64xf32> -> vector<8x64xf32>
    %cst_4 = arith.constant 2.500000e-01 : f32
    %11 = vector.broadcast %cst_4 : f32 to vector<8x64xf32>
    %12 = arith.mulf %10, %11 : vector<8x64xf32>
    %13 = arith.truncf %12 : vector<8x64xf32> to vector<8x64xbf16>
    %c0_5 = arith.constant 0 : index
    %c0_6 = arith.constant 0 : index
    %c0_7 = arith.constant 0 : index
    %14 = vector.load %arg6[%c0_5, %c0_6, %c0_7] : memref<1x1x8xf32, #tpu.memory_space<vmem>>, vector<1x1x8xf32>
    %15 = vector.shape_cast %14 : vector<1x1x8xf32> to vector<1x8xf32>
    %16 = vector.shape_cast %15 : vector<1x8xf32> to vector<1x8xf32>
    %17 = vector.broadcast %16 : vector<1x8xf32> to vector<8x8xf32>
    %18 = vector.extract_strided_slice %13 {offsets = [0, 0], sizes = [8, 16], strides = [1, 1]} : vector<8x64xbf16> to vector<8x16xbf16>
    %c0_8 = arith.constant 0 : index
    %c0_9 = arith.constant 0 : index
    %c0_10 = arith.constant 0 : index
    %19 = vector.load %arg8[%c0_8, %c0_9, %c0_10] : memref<4x8x16xbf16, #tpu.memory_space<vmem>>, vector<1x8x16xbf16>
    %20 = vector.shape_cast %19 : vector<1x8x16xbf16> to vector<8x16xbf16>
    %c0_11 = arith.constant 0 : index
    %c0_12 = arith.constant 0 : index
    %c0_13 = arith.constant 0 : index
    %21 = vector.load %arg9[%c0_11, %c0_12, %c0_13] : memref<4x8x16xbf16, #tpu.memory_space<vmem>>, vector<1x8x16xbf16>
    %22 = vector.shape_cast %21 : vector<1x8x16xbf16> to vector<8x16xbf16>
    %cst_14 = arith.constant dense<0.000000e+00> : vector<8x8xf32>
    %23 = tpu.matmul %18, %20, %cst_14 {dimension_numbers = #tpu.dot_dimension_numbers<[1], [1], [0], [0], [0, 0, 1, 0], [], []>} : vector<8x16xbf16>, vector<8x16xbf16>, vector<8x8xf32> -> vector<8x8xf32>
    %24 = arith.addf %23, %17 : vector<8x8xf32>
    %cst_15 = arith.constant dense<0xFF800000> : vector<8xf32>
    %25 = vector.multi_reduction <maximumf>, %24, %cst_15 [1] : vector<8x8xf32> to vector<8xf32>
    %26 = vector.shape_cast %25 : vector<8xf32> to vector<8x1xf32>
    %27 = vector.broadcast %26 : vector<8x1xf32> to vector<8x8xf32>
    %28 = arith.subf %24, %27 : vector<8x8xf32>
    %29 = math.exp %28 : vector<8x8xf32>
    %cst_16 = arith.constant dense<0.000000e+00> : vector<8xf32>
    %30 = vector.multi_reduction <add>, %29, %cst_16 [1] : vector<8x8xf32> to vector<8xf32>
    %31 = vector.shape_cast %30 : vector<8xf32> to vector<8x1xf32>
    %32 = arith.truncf %29 : vector<8x8xf32> to vector<8x8xbf16>
    %cst_17 = arith.constant dense<0.000000e+00> : vector<8x16xf32>
    %33 = tpu.matmul %32, %22, %cst_17 {dimension_numbers = #tpu.dot_dimension_numbers<[1], [0], [0], [1], [0, 0, 1, 1], [], []>} : vector<8x8xbf16>, vector<8x16xbf16>, vector<8x16xf32> -> vector<8x16xf32>
    %34 = tpu.reciprocal %31 {approx = true} : vector<8x1xf32> -> vector<8x1xf32>
    %35 = vector.broadcast %34 : vector<8x1xf32> to vector<8x16xf32>
    %36 = arith.mulf %33, %35 : vector<8x16xf32>
    %c0_18 = arith.constant 0 : index
    %c0_19 = arith.constant 0 : index
    %37 = vector.load %arg10[%c0_18, %c0_19] : memref<8x64xf32, #tpu.memory_space<vmem>>, vector<8x16xf32>
    tpu.vector_store %arg10[%c0_18, %c0_19], %36 {strides = array<i32>} : memref<8x64xf32, #tpu.memory_space<vmem>>, vector<8x16xf32>,
    %38 = vector.extract_strided_slice %13 {offsets = [0, 16], sizes = [8, 16], strides = [1, 1]} : vector<8x64xbf16> to vector<8x16xbf16>
    %c1 = arith.constant 1 : index
    %c0_20 = arith.constant 0 : index
    %c0_21 = arith.constant 0 : index
    %39 = vector.load %arg8[%c1, %c0_20, %c0_21] : memref<4x8x16xbf16, #tpu.memory_space<vmem>>, vector<1x8x16xbf16>
    %40 = vector.shape_cast %39 : vector<1x8x16xbf16> to vector<8x16xbf16>
    %c1_22 = arith.constant 1 : index
    %c0_23 = arith.constant 0 : index
    %c0_24 = arith.constant 0 : index
    %41 = vector.load %arg9[%c1_22, %c0_23, %c0_24] : memref<4x8x16xbf16, #tpu.memory_space<vmem>>, vector<1x8x16xbf16>
    %42 = vector.shape_cast %41 : vector<1x8x16xbf16> to vector<8x16xbf16>
    %cst_25 = arith.constant dense<0.000000e+00> : vector<8x8xf32>
    %43 = tpu.matmul %38, %40, %cst_25 {dimension_numbers = #tpu.dot_dimension_numbers<[1], [1], [0], [0], [0, 0, 1, 0], [], []>} : vector<8x16xbf16>, vector<8x16xbf16>, vector<8x8xf32> -> vector<8x8xf32>
    %44 = arith.addf %43, %17 : vector<8x8xf32>
    %cst_26 = arith.constant dense<0xFF800000> : vector<8xf32>
    %45 = vector.multi_reduction <maximumf>, %44, %cst_26 [1] : vector<8x8xf32> to vector<8xf32>
    %46 = vector.shape_cast %45 : vector<8xf32> to vector<8x1xf32>
    %47 = vector.broadcast %46 : vector<8x1xf32> to vector<8x8xf32>
    %48 = arith.subf %44, %47 : vector<8x8xf32>
    %49 = math.exp %48 : vector<8x8xf32>
    %cst_27 = arith.constant dense<0.000000e+00> : vector<8xf32>
    %50 = vector.multi_reduction <add>, %49, %cst_27 [1] : vector<8x8xf32> to vector<8xf32>
    %51 = vector.shape_cast %50 : vector<8xf32> to vector<8x1xf32>
    %52 = arith.truncf %49 : vector<8x8xf32> to vector<8x8xbf16>
    %cst_28 = arith.constant dense<0.000000e+00> : vector<8x16xf32>
    %53 = tpu.matmul %52, %42, %cst_28 {dimension_numbers = #tpu.dot_dimension_numbers<[1], [0], [0], [1], [0, 0, 1, 1], [], []>} : vector<8x8xbf16>, vector<8x16xbf16>, vector<8x16xf32> -> vector<8x16xf32>
    %54 = tpu.reciprocal %51 {approx = true} : vector<8x1xf32> -> vector<8x1xf32>
    %55 = vector.broadcast %54 : vector<8x1xf32> to vector<8x16xf32>
    %56 = arith.mulf %53, %55 : vector<8x16xf32>
    %c0_29 = arith.constant 0 : index
    %c16 = arith.constant 16 : index
    %57 = vector.load %arg10[%c0_29, %c16] : memref<8x64xf32, #tpu.memory_space<vmem>>, vector<8x16xf32>
    tpu.vector_store %arg10[%c0_29, %c16], %56 {strides = array<i32>} : memref<8x64xf32, #tpu.memory_space<vmem>>, vector<8x16xf32>,
    %58 = vector.extract_strided_slice %13 {offsets = [0, 32], sizes = [8, 16], strides = [1, 1]} : vector<8x64xbf16> to vector<8x16xbf16>
    %c2 = arith.constant 2 : index
    %c0_30 = arith.constant 0 : index
    %c0_31 = arith.constant 0 : index
    %59 = vector.load %arg8[%c2, %c0_30, %c0_31] : memref<4x8x16xbf16, #tpu.memory_space<vmem>>, vector<1x8x16xbf16>
    %60 = vector.shape_cast %59 : vector<1x8x16xbf16> to vector<8x16xbf16>
    %c2_32 = arith.constant 2 : index
    %c0_33 = arith.constant 0 : index
    %c0_34 = arith.constant 0 : index
    %61 = vector.load %arg9[%c2_32, %c0_33, %c0_34] : memref<4x8x16xbf16, #tpu.memory_space<vmem>>, vector<1x8x16xbf16>
    %62 = vector.shape_cast %61 : vector<1x8x16xbf16> to vector<8x16xbf16>
    %cst_35 = arith.constant dense<0.000000e+00> : vector<8x8xf32>
    %63 = tpu.matmul %58, %60, %cst_35 {dimension_numbers = #tpu.dot_dimension_numbers<[1], [1], [0], [0], [0, 0, 1, 0], [], []>} : vector<8x16xbf16>, vector<8x16xbf16>, vector<8x8xf32> -> vector<8x8xf32>
    %64 = arith.addf %63, %17 : vector<8x8xf32>
    %cst_36 = arith.constant dense<0xFF800000> : vector<8xf32>
    %65 = vector.multi_reduction <maximumf>, %64, %cst_36 [1] : vector<8x8xf32> to vector<8xf32>
    %66 = vector.shape_cast %65 : vector<8xf32> to vector<8x1xf32>
    %67 = vector.broadcast %66 : vector<8x1xf32> to vector<8x8xf32>
    %68 = arith.subf %64, %67 : vector<8x8xf32>
    %69 = math.exp %68 : vector<8x8xf32>
    %cst_37 = arith.constant dense<0.000000e+00> : vector<8xf32>
    %70 = vector.multi_reduction <add>, %69, %cst_37 [1] : vector<8x8xf32> to vector<8xf32>
    %71 = vector.shape_cast %70 : vector<8xf32> to vector<8x1xf32>
    %72 = arith.truncf %69 : vector<8x8xf32> to vector<8x8xbf16>
    %cst_38 = arith.constant dense<0.000000e+00> : vector<8x16xf32>
    %73 = tpu.matmul %72, %62, %cst_38 {dimension_numbers = #tpu.dot_dimension_numbers<[1], [0], [0], [1], [0, 0, 1, 1], [], []>} : vector<8x8xbf16>, vector<8x16xbf16>, vector<8x16xf32> -> vector<8x16xf32>
    %74 = tpu.reciprocal %71 {approx = true} : vector<8x1xf32> -> vector<8x1xf32>
    %75 = vector.broadcast %74 : vector<8x1xf32> to vector<8x16xf32>
    %76 = arith.mulf %73, %75 : vector<8x16xf32>
    %c0_39 = arith.constant 0 : index
    %c32 = arith.constant 32 : index
    %77 = vector.load %arg10[%c0_39, %c32] : memref<8x64xf32, #tpu.memory_space<vmem>>, vector<8x16xf32>
    tpu.vector_store %arg10[%c0_39, %c32], %76 {strides = array<i32>} : memref<8x64xf32, #tpu.memory_space<vmem>>, vector<8x16xf32>,
    %78 = vector.extract_strided_slice %13 {offsets = [0, 48], sizes = [8, 16], strides = [1, 1]} : vector<8x64xbf16> to vector<8x16xbf16>
    %c3 = arith.constant 3 : index
    %c0_40 = arith.constant 0 : index
    %c0_41 = arith.constant 0 : index
    %79 = vector.load %arg8[%c3, %c0_40, %c0_41] : memref<4x8x16xbf16, #tpu.memory_space<vmem>>, vector<1x8x16xbf16>
    %80 = vector.shape_cast %79 : vector<1x8x16xbf16> to vector<8x16xbf16>
    %c3_42 = arith.constant 3 : index
    %c0_43 = arith.constant 0 : index
    %c0_44 = arith.constant 0 : index
    %81 = vector.load %arg9[%c3_42, %c0_43, %c0_44] : memref<4x8x16xbf16, #tpu.memory_space<vmem>>, vector<1x8x16xbf16>
    %82 = vector.shape_cast %81 : vector<1x8x16xbf16> to vector<8x16xbf16>
    %cst_45 = arith.constant dense<0.000000e+00> : vector<8x8xf32>
    %83 = tpu.matmul %78, %80, %cst_45 {dimension_numbers = #tpu.dot_dimension_numbers<[1], [1], [0], [0], [0, 0, 1, 0], [], []>} : vector<8x16xbf16>, vector<8x16xbf16>, vector<8x8xf32> -> vector<8x8xf32>
    %84 = arith.addf %83, %17 : vector<8x8xf32>
    %cst_46 = arith.constant dense<0xFF800000> : vector<8xf32>
    %85 = vector.multi_reduction <maximumf>, %84, %cst_46 [1] : vector<8x8xf32> to vector<8xf32>
    %86 = vector.shape_cast %85 : vector<8xf32> to vector<8x1xf32>
    %87 = vector.broadcast %86 : vector<8x1xf32> to vector<8x8xf32>
    %88 = arith.subf %84, %87 : vector<8x8xf32>
    %89 = math.exp %88 : vector<8x8xf32>
    %cst_47 = arith.constant dense<0.000000e+00> : vector<8xf32>
    %90 = vector.multi_reduction <add>, %89, %cst_47 [1] : vector<8x8xf32> to vector<8xf32>
    %91 = vector.shape_cast %90 : vector<8xf32> to vector<8x1xf32>
    %92 = arith.truncf %89 : vector<8x8xf32> to vector<8x8xbf16>
    %cst_48 = arith.constant dense<0.000000e+00> : vector<8x16xf32>
    %93 = tpu.matmul %92, %82, %cst_48 {dimension_numbers = #tpu.dot_dimension_numbers<[1], [0], [0], [1], [0, 0, 1, 1], [], []>} : vector<8x8xbf16>, vector<8x16xbf16>, vector<8x16xf32> -> vector<8x16xf32>
    %94 = tpu.reciprocal %91 {approx = true} : vector<8x1xf32> -> vector<8x1xf32>
    %95 = vector.broadcast %94 : vector<8x1xf32> to vector<8x16xf32>
    %96 = arith.mulf %93, %95 : vector<8x16xf32>
    %c0_49 = arith.constant 0 : index
    %c48 = arith.constant 48 : index
    %97 = vector.load %arg10[%c0_49, %c48] : memref<8x64xf32, #tpu.memory_space<vmem>>, vector<8x16xf32>
    tpu.vector_store %arg10[%c0_49, %c48], %96 {strides = array<i32>} : memref<8x64xf32, #tpu.memory_space<vmem>>, vector<8x16xf32>,
    %c0_50 = arith.constant 0 : index
    %c0_51 = arith.constant 0 : index
    %98 = vector.load %arg10[%c0_50, %c0_51] : memref<8x64xf32, #tpu.memory_space<vmem>>, vector<8x64xf32>
    %c0_52 = arith.constant 0 : index
    %c0_53 = arith.constant 0 : index
    %c0_54 = arith.constant 0 : index
    %99 = vector.load %arg7[%c0_52, %c0_53, %c0_54] : memref<1x8x64xf32, #tpu.memory_space<vmem>>, vector<1x8x64xf32>
    %100 = vector.shape_cast %99 : vector<1x8x64xf32> to vector<8x64xf32>
    %101 = vector.shape_cast %98 : vector<8x64xf32> to vector<1x8x64xf32>
    tpu.vector_store %arg7[%c0_52, %c0_53, %c0_54], %101 {strides = array<i32>} : memref<1x8x64xf32, #tpu.memory_space<vmem>>, vector<1x8x64xf32>,
    return
  }
  func.func @transform_0(%arg0: i32, %arg1: i32) -> (i32, i32, i32) {
    %c0_i32 = arith.constant 0 : i32
    %c0_i32_0 = arith.constant 0 : i32
    %c0_i32_1 = arith.constant 0 : i32
    return %arg0, %c0_i32, %c0_i32_0 : i32, i32, i32
  }
  func.func @transform_1(%arg0: i32, %arg1: i32) -> (i32, i32) {
    %c0_i32 = arith.constant 0 : i32
    %c0_i32_0 = arith.constant 0 : i32
    %c0_i32_1 = arith.constant 0 : i32
    return %c0_i32, %c0_i32_0 : i32, i32
  }
  func.func @transform_2(%arg0: i32, %arg1: i32) -> (i32, i32) {
    %c0_i32 = arith.constant 0 : i32
    %c0_i32_0 = arith.constant 0 : i32
    %c0_i32_1 = arith.constant 0 : i32
    return %c0_i32, %c0_i32_0 : i32, i32
  }
  func.func @transform_3(%arg0: i32, %arg1: i32) -> (i32, i32) {
    %c0_i32 = arith.constant 0 : i32
    %c0_i32_0 = arith.constant 0 : i32
    %c0_i32_1 = arith.constant 0 : i32
    return %c0_i32, %c0_i32_0 : i32, i32
  }
  func.func @transform_4(%arg0: i32, %arg1: i32) -> (i32, i32, i32) {
    %c0_i32 = arith.constant 0 : i32
    %c0_i32_0 = arith.constant 0 : i32
    %c0_i32_1 = arith.constant 0 : i32
    return %arg0, %c0_i32, %c0_i32_0 : i32, i32, i32
  }
  func.func @transform_5(%arg0: i32, %arg1: i32) -> (i32, i32, i32) {
    %c0_i32 = arith.constant 0 : i32
    %c0_i32_0 = arith.constant 0 : i32
    return %arg0, %arg1, %c0_i32 : i32, i32, i32
  }
}

</mosaic_0001>

<bundles_post_ra>
// kernel: tpu_custom_call.1
= control target key start
LH: loop header
LB: loop body
LE: loop exit
PB: predicated region body
PF: predicated region fallthrough
CT: control target
= control target key end

     0   :  { %10 = vsyncpa [#allocation6], 0  ;;  %s2036_s0 = inlined_call_operand.hbm [shape: f32[2,8,32], index: 0, kind: input, shape index: {}]   ;;  %s2037_s1 = inlined_call_operand.hbm [shape: bf16[32,64], index: 1, kind: input, shape index: {}]   ;;  %s2038_s2 = inlined_call_operand.hbm [shape: bf16[32,64], index: 2, kind: input, shape index: {}]   ;;  %s2039_s3 = inlined_call_operand.hbm [shape: bf16[32,64], index: 3, kind: input, shape index: {}]   ;;  %s2040_s4 = inlined_call_operand.vmem [shape: f32[2,1,8], index: 4, kind: input, shape index: {}]   ;;  %s2041_s5 = inlined_call_operand.hbm [shape: f32[2,8,64], index: 5, kind: output, shape index: {}]  }
   0x1   :  { %12 = vsyncpa [#allocation6 + $0x1], 0 }
   0x2   :  { %13 = vsyncpa [#allocation9], 0 }
   0x3   :  { %14 = vsyncpa [#allocation12], 0 }
   0x4   :  { %15 = vsyncpa [#allocation7], 0 }
   0x5   :  { %17 = vsyncpa [#allocation7 + $0x1], 0  ;;  %s1659_s18 = smov 0   ;;  %s1661_s19 = smov 0  }
   0x6   :  { %s1663_s20 = smov 0   ;;  %s1665_s21 = smov 0  }
   0x7   :  { %s1667_s22 = smov 0   ;;  %s1669_s23 = smov 0  }
   0x8 LB: > { %2048 = sst [smem:[#allocation18_spill]] %s1592_s18  ;;  %s1145_s24 = sadd.s32 4294967295, %s1612_s23   ;;  %s1612_s23 = sphi %s1669_s23, %s23_s23   ;;  %s1608_s22 = sphi %s1667_s22, %s2071_s22   ;;  %s1604_s21 = sphi %s1665_s21, %s2070_s21   ;;  %s1600_s20 = sphi %s1663_s20, %s2069_s20   ;;  %s1596_s19 = sphi %s1661_s19, %s2068_s19   ;;  %s1592_s18 = sphi %s1659_s18, %s2067_s18  }
   0x9   : > { %s1146_s25 = sadd.s32 4294967294, %s1612_s23   ;;  %p55_p0 = scmp.ne.s32.totalorder %s1596_s19, %s1592_s18 }
   0xa   : > { %p1693_p1 = scmp.eq.s32.totalorder %s1145_s24, 0  ;;  %p1697_p2 = scmp.eq.s32.totalorder %s1145_s24, 1 }
   0xb   : > { %p176_p3 = scmp.eq.s32.totalorder %s1146_s25, 1  ;;  %p1147_p5 = scmp.ge.s32.totalorder %s1612_s23, 1 }
   0xc   : > { %s2049_s26 = scalar_select %p1693_p1, 1, 0 }
   0xd   : > { %s2050_s27 = scalar_select %p1697_p2, 1, 0 }
   0xe   : > { %p1703_p4 = por %p1693_p1, %p55_p0  ;;  %p1708_p6 = por %p176_p3, %p55_p0 }
   0xf   : > { %p183_p7 = scmp.lt.s32.totalorder %s1612_s23, 3  ;;  %s1614_s6 = smov [#allocation8]  }
  0x10   : > { %s2051_s28 = scalar_select %p1703_p4, 1, 0 }
  0x11   : > { %s2052_s29 = scalar_select %p1708_p6, 1, 0 }
  0x12   : > { %p1713_p8 = pnand %p1147_p5, %p183_p7  ;;  %s195_s7 = sshll.u32 %s1614_s6, 4  ;;  %s1717_s7 = int_to_ptr.vmem [resolvable:$true] %s195_s7 }
  0x13   : > { %2053 = sst [smem:[#allocation19_spill]] %s2052_s29  ;;  %s1615_s9 = smov [#allocation10]  }
  0x14   : > { %s2054_s30 = scalar_select %p1713_p8, 1, 0 }
  0x15   : > { %p1299_p9 = pneg %p1713_p8  ;;  %s208_s10 = sshll.u32 %s1615_s9, 4  ;;  %s1728_s10 = int_to_ptr.vmem [resolvable:$true] %s208_s10 }
  0x16   : > { %s1616_s11 = smov [#allocation11]   ;;  %s1408_s15 = scalar_lea.hbm %s2037_s1, 256 }
  0x17   : > { %p1724_p11 = pnand %p1299_p9, %p1693_p1  ;;  %s1730_s12 = sshll.u32 %s1616_s11, 4  ;;  %s222_s12 = int_to_ptr.vmem [resolvable:$true] %s1730_s12 }
  0x18   : > { %p1409_p12 = scmp.ne.s32.totalorder %s2037_s1, %s1408_s15  ;;  %p1415_p5 = scmp.lt.u32.totalorder %s1408_s15, %s2037_s1 }
  0x19   : > { %p1740_p13 = pneg %p1724_p11 }
  0x1b   : > { %p1411_p0 = pnand %p1740_p13, %p1409_p12 }
  0x1d   : > { %p1412_p3 = pneg %p1411_p0 }
  0x1f   : > { %p1417_p7 = pnand %p1415_p5, %p1412_p3 }
  0x21   : > { %1420 = shalt.err (!%p1417_p7)
}
  0x22   : > { %s1421_s9 = scalar_lea.vmem %s1717_s7, 256  ;;  %p1429_p1 = scmp.lt.s32.totalorder %s1717_s7, %s1717_s7 }
  0x23   : > { %p1422_p9 = scmp.ne.s32.totalorder %s1717_s7, %s1421_s9  ;;  %p1430_p4 = scmp.lt.s32.totalorder %s1421_s9, %s1421_s9 }
  0x25   : > { %p1424_p10 = pnand %p1422_p9, %p1740_p13  ;;  %p1431_p12 = por %p1430_p4, %p1429_p1 }
  0x27   : > { %p1425_p6 = pneg %p1424_p10 }
  0x29   : > { %p1432_p0 = pnand %p1431_p12, %p1425_p6 }
  0x2b   : > { %1435 = shalt.err (!%p1432_p0)
}
  0x2c   : > { %s1617_s11 = smov 64   ;;  %s1618_s13 = smov 4  }
  0x2d   : > { %1302 = dma.hbm_to_vmem [thread:$0]  (!%p1724_p11), %s2037_s1, 256, %s1717_s7, [#allocation9], %s1617_s11, %s1617_s11, %s1618_s13  }
  0x2e   : > { %s1436_s25 = scalar_lea.hbm %s2038_s2, 256 }
  0x2f   : > { %p1437_p1 = scmp.ne.s32.totalorder %s2038_s2, %s1436_s25  ;;  %p1443_p10 = scmp.lt.u32.totalorder %s1436_s25, %s2038_s2 }
  0x31   : > { %p1439_p4 = pnand %p1437_p1, %p1740_p13 }
  0x33   : > { %p1440_p6 = pneg %p1439_p4 }
  0x35   : > { %p1445_p3 = pnand %p1443_p10, %p1440_p6 }
  0x37   : > { %1448 = shalt.err (!%p1445_p3)
}
  0x38   : > { %s1449_s7 = scalar_lea.vmem %s1728_s10, 256  ;;  %p1457_p12 = scmp.lt.s32.totalorder %s1728_s10, %s1728_s10 }
  0x39   : > { %p1450_p5 = scmp.ne.s32.totalorder %s1728_s10, %s1449_s7  ;;  %p1458_p0 = scmp.lt.s32.totalorder %s1449_s7, %s1449_s7 }
  0x3b   : > { %p1452_p7 = pnand %p1450_p5, %p1740_p13  ;;  %p1459_p1 = por %p1458_p0, %p1457_p12 }
  0x3d   : > { %p1453_p9 = pneg %p1452_p7 }
  0x3f   : > { %p1460_p4 = pnand %p1459_p1, %p1453_p9 }
  0x41   : > { %1463 = shalt.err (!%p1460_p4)
}
  0x42   : > { %1305 = dma.hbm_to_vmem [thread:$0]  (!%p1724_p11), %s2038_s2, 256, %s1728_s10, [#allocation9], %s1617_s11, %s1617_s11, %s1618_s13  }
  0x43   : > { %s1464_s16 = scalar_lea.hbm %s2039_s3, 256 }
  0x44   : > { %p1465_p6 = scmp.ne.s32.totalorder %s2039_s3, %s1464_s16  ;;  %p1471_p5 = scmp.lt.u32.totalorder %s1464_s16, %s2039_s3 }
  0x46   : > { %p1467_p10 = pnand %p1465_p6, %p1740_p13 }
  0x48   : > { %p1468_p3 = pneg %p1467_p10 }
  0x4a   : > { %p1473_p7 = pnand %p1471_p5, %p1468_p3 }
  0x4c   : > { %1476 = shalt.err (!%p1473_p7)
}
  0x4d   : > { %s1477_s7 = scalar_lea.vmem %s222_s12, 256  ;;  %p1485_p1 = scmp.lt.s32.totalorder %s222_s12, %s222_s12 }
  0x4e   : > { %p1478_p9 = scmp.ne.s32.totalorder %s222_s12, %s1477_s7  ;;  %p1486_p4 = scmp.lt.s32.totalorder %s1477_s7, %s1477_s7 }
  0x50   : > { %p1480_p12 = pnand %p1478_p9, %p1740_p13  ;;  %p1487_p8 = por %p1486_p4, %p1485_p1 }
  0x52   : > { %p1481_p0 = pneg %p1480_p12 }
  0x54   : > { %p1488_p2 = pnand %p1487_p8, %p1481_p0 }
  0x56   : > { %1491 = shalt.err (!%p1488_p2)
}
  0x57   : > { %1308 = dma.hbm_to_vmem [thread:$0]  (!%p1724_p11), %s2039_s3, 256, %s222_s12, [#allocation12], %s1617_s11, %s1617_s11, %s1618_s13  }
  0x58   : > { %s42_s24 = sadd.s32 1, %s1600_s20  ;;  %s35_s8 = sadd.s32 1, %s1608_s22 }
  0x59   : > { %p49_p2 = scmp.ne.s32.totalorder %s1600_s20, %s1596_s19  ;;  %p37_p8 = scmp.ge.s32.totalorder %s35_s8, 2 }
  0x5a   : > { %p50_p13 = scmp.eq.s32.totalorder %s1612_s23, 0  ;;  %p2057_p6 = scmp.ne.s32.totalorder %s2050_s27, 0 }
  0x5b   : > { %p1320_p3 = scmp.lt.s32.totalorder %s1612_s23, 2  ;;  %s2073_s8 = smov (%p37_p8, %s35_s8), 0 }
  0x5c   : > { %p1819_p10 = por %p2057_p6, %p49_p2  ;;  %p51_p5 = por %p50_p13, %p49_p2 }
  0x5d   : > { %s235_s14 = sand.u32 1, %s1600_s20   ;;  %s39_s15 = ssub.s32 %s1608_s22, %s2073_s8 }
  0x5e   : > { %p40_p7 = scmp.eq.s32.totalorder %s39_s15, 0  ;;  %s1152_s12 = sshll.u32 %s235_s14, 3 }
  0x5f   : > { %s1153_s11 = sshll.u32 %s1608_s22, 7  ;;  %s239_s25 = scalar_lea.vmem [#allocation5], %s1152_s12 }
  0x60   : > { %s1831_s13 = scalar_select %p40_p7, %s1600_s20, %s42_s24  }
  0x61   : > { %s1836_s27 = scalar_lea.hbm %s2036_s0, %s1153_s11  ;;  %s246_s6 = sshll.u32 %s239_s25, 4  ;;  %s1838_s6 = int_to_ptr.vmem [resolvable:$true] %s246_s6 }
  0x62   : > { %p1842_p11 = pnand %p1320_p3, %p51_p5  ;;  %s236_s7 = scalar_lea.sflag [#allocation6], %s235_s14 }
  0x63   : > { %s1492_s10 = scalar_lea.hbm %s1836_s27, 128  ;;  %s1497_s15 = scalar_lea.hbm %s2036_s0, 256 }
  0x64   : > { %p1493_p9 = scmp.ne.s32.totalorder %s1836_s27, %s1492_s10  ;;  %p1494_p12 = pneg %p1842_p11 }
  0x65   : > { %p1498_p4 = scmp.lt.u32.totalorder %s1836_s27, %s2036_s0  ;;  %p1499_p2 = scmp.lt.u32.totalorder %s1497_s15, %s1492_s10 }
  0x66   : > { %p1495_p0 = pnand %p1494_p12, %p1493_p9  ;;  %p1501_p13 = scmp.lt.u32.totalorder %s1492_s10, %s1836_s27 }
  0x67   : > { %p1500_p8 = por %p1499_p2, %p1498_p4 }
  0x68   : > { %p1496_p1 = pneg %p1495_p0 }
  0x69   : > { %p1502_p6 = por %p1501_p13, %p1500_p8 }
  0x6b   : > { %p1503_p3 = pnand %p1502_p6, %p1496_p1 }
  0x6d   : > { %1506 = shalt.err (!%p1503_p3)
}
  0x6e   : > { %s1507_s14 = scalar_lea.vmem %s1838_s6, 128  ;;  %s1619_s16 = smov [#allocation5]  }
  0x6f   : > { %p1508_p5 = scmp.ne.s32.totalorder %s1838_s6, %s1507_s14  ;;  %s1512_s17 = sshll.u32 %s1619_s16, 4  ;;  %s1513_s17 = int_to_ptr.vmem [resolvable:$false] %s1512_s17 }
  0x70   : > { %s1514_s25 = scalar_lea.vmem %s1513_s17, 256  ;;  %p1515_p0 = scmp.lt.s32.totalorder %s1838_s6, %s1513_s17 }
  0x71   : > { %p1510_p7 = pnand %p1508_p5, %p1494_p12  ;;  %p1516_p4 = scmp.lt.s32.totalorder %s1514_s25, %s1507_s14 }
  0x73   : > { %p1511_p9 = pneg %p1510_p7  ;;  %p1517_p2 = por %p1516_p4, %p1515_p0 }
  0x75   : > { %p1518_p8 = pnand %p1517_p2, %p1511_p9 }
  0x77   : > { %1521 = shalt.err (!%p1518_p8)
}
  0x78   : > { %1312 = dma.hbm_to_vmem [thread:$0]  (!%p1842_p11), %s1836_s27, 128, %s1838_s6, %s236_s7  }
  0x79   : > { %p2060_p1 = scmp.ne.s32.totalorder %s2054_s30, 0 }
  0x7a   : > { %s1874_s10 = sand.u32 (!%p2060_p1), 1, %s1596_s19   ;;  %p2061_p12 = scmp.ne.s32.totalorder (!%p2060_p1), %s2051_s28, 0 }
  0x7b   : > { %261 = sbr.rel (%p2060_p1) target bundleno = 1239 (0x4d7), region = 40  ;;  %s1155_s18 = sshll.u32 (!%p2060_p1), %s1874_s10, 3 }
  0x7c   : > { %s264_s24 = scalar_lea.sflag (!%p2060_p1), [#allocation6], %s1874_s10  ;;  %s267_s15 = scalar_lea.vmem (!%p2060_p1), [#allocation5], %s1155_s18 }
  0x82   : > { %1575 = dma.done.wait (%p2061_p12), %s264_s24, 128  }
  0x83   : > { %1577 = vsyncadd (%p2061_p12), %s264_s24, 4294967168  ;;  %p2062_p11 = scmp.ne.s32.totalorder %s2049_s26, 0 }
  0x85   : > { %1579 = dma.done.wait (%p2062_p11), [#allocation9], 512  }
  0x86   : > { %1581 = vsyncadd (%p2062_p11), [#allocation9], 4294966784 }
  0x87   : > { %1583 = dma.done.wait (%p2062_p11), [#allocation12], 256  }
  0x88   : > { %1585 = vsyncadd (%p2062_p11), [#allocation12], 4294967040  ;;  %v1620_v0 = vmov 0.0   ;;  %vm1621_vm0 = vmmov 0   ;;  %v1386_v1 = vld [vmem:[#allocation10] sm:$0xff]   ;;  %v1387_v2 = vld [vmem:[#allocation10 + $0x8] sm:$0xff]  }
  0x89   : > { %1211 = vmatprep.subr.bf16.mxu0 %v1620_v0  ;;  %1215 = vmatprep.mubr.msk.bf16.mxu0 %vm1621_vm0, %v1620_v0  ;;  %v317_v3 = vld [vmem:[%s267_s15] sm:$0xff]  ;;  %v1390_v5 = vld [vmem:[#allocation11] sm:$0xff]   ;;  %vm335_vm1 = vcmask 261120   ;;  %v1389_v7 = vld [vmem:[#allocation8 + $0x8] sm:$0xff]   ;;  %vm436_vm2 = vcmask 125952   ;;  %s1622_s26 = smov 80  }
  0x8a   : > { %1219 = vmatprep.subr.bf16.mxu1 %v1620_v0  ;;  %1223 = vmatprep.mubr.msk.bf16.mxu1 %vm1621_vm0, %v1620_v0  ;;  %v318_v4 = vpack.c.bf16 %v317_v3, %v317_v3  ;;  %v1388_v6 = vld [vmem:[#allocation8] sm:$0xff]   ;;  %v1391_v8 = vld [vmem:[#allocation11 + $0x8] sm:$0xff]   ;;  %s1623_s28 = smov 112   ;;  %s1624_s30 = smov 96   ;;  %vm551_vm3 = vcmask 130048   ;;  %vm612_vm4 = vcmask 1043456  }
  0x8b   : > { %1212 = vmatpush3.bf16.msra.mxu0 %v1386_v1  ;;  %1220 = vmatpush3.bf16.msra.mxu1 %v1390_v5  ;;  %p309_p13 = scmp.lt.s32.totalorder %s1604_s21, 1  ;;  %vm598_vm5 = vcmask 64512   ;;  %s1625_s12 = smov 16   ;;  %vm774_vm6 = vcmask 261248   ;;  %vm890_vm7 = vcmask 392448   ;;  %vm1006_vm8 = vcmask 523648  }
  0x8c   : > { %1213 = vmatprep.subr.bf16.mxu0 %v1620_v0  ;;  %1221 = vmatprep.subr.bf16.mxu1 %v1620_v0  ;;  %s1626_s11 = smov 32   ;;  %s1627_s14 = smov 48   ;;  %vm1009_vm9 = vcmask 523264  }
  0x8d   : > { %s310_s27 = scalar_select %p309_p13, %s1604_s21, 1 }
  0x8e   : > { %s1181_s16 = sshll.u32 %s1604_s21, 7  ;;  %s308_s17 = scalar_lea.vmem [#allocation13], %s1155_s18 }
  0x8f   : > { %1214 = vmatpush3.bf16.msra.mxu0 %v1387_v2  ;;  %1222 = vmatpush3.bf16.msra.mxu1 %v1391_v8  ;;  %s311_s7 = scalar_lea.vmem %s2040_s4, %s310_s27  ;;  %s1026_s25 = sshll.u32 %s308_s17, 4  ;;  %s1989_s25 = int_to_ptr.vmem [resolvable:$true] %s1026_s25 }
  0x90   : > { %1227 = vmatprep.subr.bf16.mxu0 %v1620_v0  ;;  %1235 = vmatprep.subr.bf16.mxu1 %v1620_v0  ;;  %v1171_v41 = vld [vmem:[%s311_s7] ss:$0 sm:$0xff]  ;;  %s1628_s21 = smov [#allocation13]  }
  0x91   : > { %s1526_s18 = sshll.u32 %s1628_s21, 4  ;;  %s1527_s18 = int_to_ptr.vmem [resolvable:$false] %s1526_s18 }
  0x92   : > { %1216 = vmatmul.mubr.msk.bf16.vlgmr.msra.gmra.mrb[0].mxu0 %vm335_vm1, %v318_v4  ;;  %1224 = vmatmul.mubr.msk.bf16.vlgmr.msra.gmra.mrb[0].mxu1 %vm335_vm1, %v318_v4  ;;  %s1528_s27 = scalar_lea.vmem %s1527_s18, 256  ;;  %p1529_p7 = scmp.lt.s32.totalorder %s1989_s25, %s1527_s18 }
  0x93   : > { %1228 = vmatpush3.bf16.msra.mxu0 %v1388_v6  ;;  %1231 = vmatprep.mubr.msk.bf16.mxu0 %vm1621_vm0, %v1620_v0 }
  0x94   : > { %1229 = vmatprep.subr.bf16.mxu0 %v1620_v0  ;;  %1237 = vmatprep.mubr.msk.bf16.mxu1 %vm1621_vm0, %v1620_v0 }
  0x97   : > { %1230 = vmatpush3.bf16.msra.mxu0 %v1389_v7 }
  0x98   : > { %1241 = vmatprep.subr.bf16.mxu0 %v1620_v0 }
  0x9a   : > { %1232 = vmatmul.mubr.msk.bf16.vlgmr.msra.gmra.mrb[4].mxu0 %vm335_vm1, %v318_v4 }
  0x9b   : > { %1243 = vmatprep.mubr.msk.bf16.mxu0 %vm1621_vm0, %v1620_v0 }
 0x165   : > { %v373_v9 = vpop.f32.mrb[0].mxu0  ;;  %v429_v22 = vpop.f32.mrb[0].mxu1 }
 0x166   : > { %v435_v10 = vpack.c.bf16 %v373_v9, %v373_v9  ;;  %v1217_v11 = vpop.f32.mrb[1].mxu0  ;;  %v1923_v23 = vpack.c.bf16 %v429_v22, %v429_v22  ;;  %v1225_v24 = vpop.f32.mrb[1].mxu1 }
 0x167   : > { %v376_v12 = vpop.f32.mrb[2].mxu0  ;;  %v432_v25 = vpop.f32.mrb[2].mxu1 }
 0x168   : > { %437 = vst.msk [vmem:[#allocation2] sm:$0xf] %vm436_vm2, %v435_v10  ;;  %466 = vrot.lane.b32.xlu1 %v435_v10, %s1622_s26  ;;  %443 = vrot.lane.b32.xlu0 %v435_v10, %s1623_s28  ;;  %v1218_v13 = vpop.f32.mrb[3].mxu0  ;;  %439 = vst.msk [vmem:[#allocation3] sm:$0xf] %vm436_vm2, %v1923_v23  ;;  %v1226_v26 = vpop.f32.mrb[3].mxu1 }
 0x16c   : > { %456 = vrot.lane.b32.xlu0 %v435_v10, %s1624_s30 }
 0x16d   : > { %v534_v14 = vpop.f32.mrb[4].mxu0 }
 0x16e   : > { %v540_v15 = vmul.f32 0.25, %v534_v14  ;;  %v1233_v16 = vpop.f32.mrb[5].mxu0 }
 0x16f   : > { %v549_v17 = vld [vmem:[#allocation2] sm:$0xf]  ;;  %v537_v18 = vpop.f32.mrb[6].mxu0  ;;  %v550_v27 = vld [vmem:[#allocation3] sm:$0xf] }
 0x170   : > { %v541_v19 = vpack.c.bf16 %v540_v15, %v540_v15  ;;  %v556_v20 = vsel %vm551_vm3, %v549_v17, 0  ;;  %v1234_v21 = vpop.f32.mrb[7].mxu0  ;;  %v614_v28 = vsel %vm612_vm4, %v550_v27, 0 }
 0x171   : > { %1236 = vmatpush3.bf16.xpose.msra.mxu1 %v556_v20  ;;  %1242 = vmatpush3.bf16.msra.mxu0 %v614_v28 }
 0x172   : > { %664 = vrot.lane.b32.xlu1 %v541_v19, %s1623_s28  ;;  %780 = vrot.lane.b32.xlu0 %v541_v19, %s1624_s30 }
 0x173   : > { %1247 = vmatprep.subr.bf16.mxu1 %v1620_v0  ;;  %1253 = vmatprep.subr.bf16.mxu0 %v1620_v0 }
 0x176   : > { %896 = vrot.lane.b32.xlu1 %v541_v19, %s1622_s26 }
 0x178   : > { %1238 = vmatmul.mubr.msk.bf16.vlgmr.msra.gmra.mrb[4].mxu1 %vm551_vm3, %v541_v19 }
 0x179   : > { %1249 = vmatprep.mubr.msk.bf16.mxu1 %vm1621_vm0, %v1620_v0 }
 0x17a   : > { %451 = vrot.lane.b32.xlu1 %v1923_v23, %s1623_s28  ;;  %s1012_s28 = scalar_lea.sflag [#allocation7], %s1874_s10 }
 0x1da   : > { %v467_v29 = vpop.permute.xlu1 %466  ;;  %v444_v30 = vpop.permute.xlu0 %443 }
 0x1db   : > { %470 = vst.msk [vmem:[#allocation2 + $0xc] sm:$0xf] %vm436_vm2, %v467_v29  ;;  %447 = vst.msk [vmem:[#allocation2 + $0x4] sm:$0xf] %vm436_vm2, %v444_v30 }
 0x1de   : > { %v457_v31 = vpop.permute.xlu0 %456 }
 0x1df   : > { %460 = vst.msk [vmem:[#allocation2 + $0x8] sm:$0xf] %vm436_vm2, %v457_v31 }
 0x1e2   : > { %v660_v32 = vld [vmem:[#allocation2 + $0x4] sm:$0xf]  ;;  %v893_v37 = vld [vmem:[#allocation2 + $0xc] sm:$0xf] }
 0x1e3   : > { %v670_v33 = vsel %vm551_vm3, %v660_v32, 0  ;;  %v902_v39 = vsel %vm551_vm3, %v893_v37, 0 }
 0x1e4   : > { %1248 = vmatpush3.bf16.xpose.msra.mxu1 %v670_v33  ;;  %v665_v35 = vpop.permute.xlu1 %664  ;;  %v781_v38 = vpop.permute.xlu0 %780 }
 0x1e5   : > { %1259 = vmatprep.subr.bf16.mxu1 %v1620_v0 }
 0x1e6   : > { %v777_v34 = vld [vmem:[#allocation2 + $0x8] sm:$0xf] }
 0x1e7   : > { %v786_v36 = vsel %vm551_vm3, %v777_v34, 0 }
 0x1e8   : > { %v897_v40 = vpop.permute.xlu1 %896 }
 0x1eb   : > { %1250 = vmatmul.mubr.msk.bf16.vlgmr.msra.gmra.mrb[8].mxu1 %vm551_vm3, %v665_v35 }
 0x1ec   : > { %1260 = vmatpush3.bf16.xpose.msra.mxu1 %v786_v36  ;;  %1261 = vmatprep.mubr.msk.bf16.mxu1 %vm1621_vm0, %v1620_v0  ;;  %v452_v48 = vpop.permute.xlu1 %451 }
 0x1ed   : > { %1271 = vmatprep.subr.bf16.mxu1 %v1620_v0  ;;  %455 = vst.msk [vmem:[#allocation3 + $0x4] sm:$0xf] %vm436_vm2, %v452_v48 }
 0x1f3   : > { %1262 = vmatmul.mubr.msk.bf16.vlgmr.msra.gmra.mrb[12].mxu1 %vm551_vm3, %v781_v38 }
 0x1f4   : > { %1272 = vmatpush3.bf16.xpose.msra.mxu1 %v902_v39  ;;  %1273 = vmatprep.mubr.msk.bf16.mxu1 %vm1621_vm0, %v1620_v0  ;;  %v662_v7 = vld [vmem:[#allocation3 + $0x4] sm:$0xf] }
 0x1f5   : > { %v726_v10 = vsel %vm612_vm4, %v662_v7, 0 }
 0x1fb   : > { %1274 = vmatmul.mubr.msk.bf16.vlgmr.msra.gmra.mrb[16].mxu1 %vm551_vm3, %v897_v40 }
 0x24b   : > { %v592_v42 = vpop.f32.mrb[4].mxu1 }
 0x24c   : > { %v593_v43 = vadd.f32 %v1171_v41, %v592_v42  ;;  %v1239_v44 = vpop.f32.mrb[5].mxu1 }
 0x24d   : > { %v595_v45 = vpop.f32.mrb[6].mxu1 }
 0x24e   : > { %v1240_v46 = vpop.f32.mrb[7].mxu1  ;;  %v599_v47 = vsel %vm598_vm5, %v593_v43, -inf }
 0x24f   : > { %600 = vmax.xlane.f32.xlu0 %v599_v47 }
 0x2be   : > { %v706_v49 = vpop.f32.mrb[8].mxu1 }
 0x2bf   : > { %v707_v50 = vadd.f32 %v1171_v41, %v706_v49  ;;  %v1251_v51 = vpop.f32.mrb[9].mxu1 }
 0x2c0   : > { %v709_v52 = vpop.f32.mrb[10].mxu1 }
 0x2c1   : > { %v1252_v53 = vpop.f32.mrb[11].mxu1  ;;  %v712_v54 = vsel %vm598_vm5, %v707_v50, -inf }
 0x2c2   : > { %713 = vmax.xlane.f32.xlu1 %v712_v54 }
 0x2c6   : > { %v822_v55 = vpop.f32.mrb[12].mxu1 }
 0x2c7   : > { %v823_v56 = vadd.f32 %v1171_v41, %v822_v55  ;;  %v1263_v57 = vpop.f32.mrb[13].mxu1 }
 0x2c8   : > { %v825_v58 = vpop.f32.mrb[14].mxu1 }
 0x2c9   : > { %v1264_v59 = vpop.f32.mrb[15].mxu1  ;;  %v828_v60 = vsel %vm598_vm5, %v823_v56, -inf }
 0x2ca   : > { %829 = vmax.xlane.f32.xlu0 %v828_v60 }
 0x2ce   : > { %v938_v61 = vpop.f32.mrb[16].mxu1 }
 0x2cf   : > { %v939_v62 = vadd.f32 %v1171_v41, %v938_v61  ;;  %v1275_v63 = vpop.f32.mrb[17].mxu1 }
 0x2d0   : > { %v941_v1 = vpop.f32.mrb[18].mxu1 }
 0x2d1   : > { %v1276_v2 = vpop.f32.mrb[19].mxu1  ;;  %v944_v3 = vsel %vm598_vm5, %v939_v62, -inf }
 0x2d2   : > { %945 = vmax.xlane.f32.xlu0 %v944_v3 }
 0x2d3   : > { %471 = vrot.lane.b32.xlu1 %v1923_v23, %s1622_s26  ;;  %s1987_s26 = scalar_lea.hbm %s2041_s5, %s1181_s16 }
 0x2dc   : > { %v601_v4 = vpop.xlane.xlu0 %600 }
 0x2dd   : > { %v602_v5 = vsub.f32 %v593_v43, %v601_v4 }
 0x2df   : > { %v603_v6 = vmul.f32 1.442695, %v602_v5 }
 0x2e1   : > { %1392 = vpow2.f32 %v603_v6 }
 0x2e8   : > { %461 = vrot.lane.b32.xlu0 %v1923_v23, %s1624_s30  ;;  %s1522_s30 = scalar_lea.vmem %s1989_s25, 128 }
 0x2e9   : > { %p1523_p6 = scmp.ne.s32.totalorder %s1989_s25, %s1522_s30  ;;  %p1530_p9 = scmp.lt.s32.totalorder %s1528_s27, %s1522_s30 }
 0x2eb   : > { %v1393_v8 = vpop.eup %1392  ;;  %p1524_p3 = pnand %p1523_p6, %p1819_p10  ;;  %p1531_p0 = por %p1530_p9, %p1529_p7 }
 0x2ec   : > { %v608_v9 = vpack.c.bf16 %v1393_v8, %v1393_v8  ;;  %v605_v25 = vsel %vm598_vm5, %v1393_v8, 0.0 }
 0x2ed   : > { %p1525_p5 = pneg %p1524_p3 }
 0x2ee   : > { %1244 = vmatmul.mubr.msk.bf16.vlgmr.msra.gmra.mrb[8].mxu0 %vm598_vm5, %v608_v9 }
 0x2ef   : > { %1254 = vmatpush3.bf16.msra.mxu0 %v726_v10  ;;  %1255 = vmatprep.mubr.msk.bf16.mxu0 %vm1621_vm0, %v1620_v0  ;;  %p1532_p4 = pnand %p1531_p0, %p1525_p5 }
 0x2f0   : > { %1265 = vmatprep.subr.bf16.mxu0 %v1620_v0 }
 0x34f   : > { %v714_v11 = vpop.xlane.xlu1 %713 }
 0x350   : > { %v715_v12 = vsub.f32 %v707_v50, %v714_v11 }
 0x352   : > { %v716_v13 = vmul.f32 1.442695, %v715_v12 }
 0x353   : > { %v472_v14 = vpop.permute.xlu1 %471 }
 0x354   : > { %1394 = vpow2.f32 %v716_v13  ;;  %475 = vst.msk [vmem:[#allocation3 + $0xc] sm:$0xf] %vm436_vm2, %v472_v14 }
 0x357   : > { %v830_v15 = vpop.xlane.xlu0 %829 }
 0x358   : > { %v831_v16 = vsub.f32 %v823_v56, %v830_v15 }
 0x35a   : > { %v832_v17 = vmul.f32 1.442695, %v831_v16 }
 0x35b   : > { %v895_v30 = vld [vmem:[#allocation3 + $0xc] sm:$0xf] }
 0x35c   : > { %1396 = vpow2.f32 %v832_v17  ;;  %v958_v34 = vsel %vm612_vm4, %v895_v30, 0 }
 0x35e   : > { %v1395_v18 = vpop.eup %1394 }
 0x35f   : > { %v946_v19 = vpop.xlane.xlu0 %945  ;;  %v718_v20 = vsel %vm598_vm5, %v1395_v18, 0.0  ;;  %v721_v21 = vpack.c.bf16 %v1395_v18, %v1395_v18 }
 0x360   : > { %v947_v22 = vsub.f32 %v939_v62, %v946_v19  ;;  %719 = vadd.xlane.f32.xlu1 %v718_v20 }
 0x361   : > { %1256 = vmatmul.mubr.msk.bf16.vlgmr.msra.gmra.mrb[12].mxu0 %vm598_vm5, %v721_v21 }
 0x362   : > { %v948_v23 = vmul.f32 1.442695, %v947_v22  ;;  %1267 = vmatprep.mubr.msk.bf16.mxu0 %vm1621_vm0, %v1620_v0 }
 0x363   : > { %v462_v24 = vpop.permute.xlu0 %461 }
 0x364   : > { %1398 = vpow2.f32 %v948_v23  ;;  %465 = vst.msk [vmem:[#allocation3 + $0x8] sm:$0xf] %vm436_vm2, %v462_v24  ;;  %606 = vadd.xlane.f32.xlu1 %v605_v25 }
 0x366   : > { %v1397_v26 = vpop.eup %1396 }
 0x367   : > { %v834_v27 = vsel %vm598_vm5, %v1397_v26, 0.0  ;;  %v837_v32 = vpack.c.bf16 %v1397_v26, %v1397_v26 }
 0x368   : > { %835 = vadd.xlane.f32.xlu0 %v834_v27 }
 0x36b   : > { %v779_v28 = vld [vmem:[#allocation3 + $0x8] sm:$0xf] }
 0x36c   : > { %v842_v29 = vsel %vm612_vm4, %v779_v28, 0 }
 0x36d   : > { %1266 = vmatpush3.bf16.msra.mxu0 %v842_v29 }
 0x36e   : > { %v1399_v31 = vpop.eup %1398  ;;  %1277 = vmatprep.subr.bf16.mxu0 %v1620_v0 }
 0x36f   : > { %v950_v33 = vsel %vm598_vm5, %v1399_v31, 0.0  ;;  %v953_v35 = vpack.c.bf16 %v1399_v31, %v1399_v31 }
 0x370   : > { %951 = vadd.xlane.f32.xlu0 %v950_v33  ;;  %1268 = vmatmul.mubr.msk.bf16.vlgmr.msra.gmra.mrb[16].mxu0 %vm598_vm5, %v837_v32 }
 0x371   : > { %1278 = vmatpush3.bf16.msra.mxu0 %v958_v34  ;;  %1279 = vmatprep.mubr.msk.bf16.mxu0 %vm1621_vm0, %v1620_v0 }
 0x378   : > { %1280 = vmatmul.mubr.msk.bf16.vlgmr.msra.gmra.mrb[20].mxu0 %vm598_vm5, %v953_v35 }
 0x3c1   : > { %v650_v36 = vpop.f32.mrb[8].mxu0 }
 0x3c2   : > { %v1245_v37 = vpop.f32.mrb[9].mxu0 }
 0x3c3   : > { %v653_v38 = vpop.f32.mrb[10].mxu0 }
 0x3c4   : > { %v1246_v39 = vpop.f32.mrb[11].mxu0 }
 0x3ed   : > { %v720_v40 = vpop.xlane.xlu1 %719 }
 0x3f1   : > { %v607_v41 = vpop.xlane.xlu1 %606 }
 0x3f2   : > { %1400 = vrcp.f32 %v607_v41 }
 0x3f3   : > { %1402 = vrcp.f32 %v720_v40 }
 0x3f5   : > { %v836_v0 = vpop.xlane.xlu0 %835 }
 0x3f6   : > { %1404 = vrcp.f32 %v836_v0 }
 0x3fc   : > { %v1401_v42 = vpop.eup %1400 }
 0x3fd   : > { %v657_v43 = vmul.f32 %v1401_v42, %v650_v36  ;;  %v1403_v44 = vpop.eup %1402  ;;  %v952_v50 = vpop.xlane.xlu0 %951 }
 0x3fe   : > { %1406 = vrcp.f32 %v952_v50 }
 0x3ff   : > { %658 = vst.msk [vmem:[#allocation4] sm:$0xff] %vm551_vm3, %v657_v43 }
 0x400   : > { %v1405_v51 = vpop.eup %1404 }
 0x408   : > { %v1407_v57 = vpop.eup %1406 }
 0x434   : > { %v762_v45 = vpop.f32.mrb[12].mxu0 }
 0x435   : > { %v769_v46 = vmul.f32 %v1403_v44, %v762_v45  ;;  %v1257_v47 = vpop.f32.mrb[13].mxu0 }
 0x436   : > { %v765_v48 = vpop.f32.mrb[14].mxu0 }
 0x437   : > { %771 = vrot.lane.b32.xlu0 %v769_v46, %s1625_s12  ;;  %v1258_v49 = vpop.f32.mrb[15].mxu0 }
 0x443   : > { %v878_v52 = vpop.f32.mrb[16].mxu0 }
 0x444   : > { %v885_v53 = vmul.f32 %v1405_v51, %v878_v52  ;;  %v1269_v54 = vpop.f32.mrb[17].mxu0 }
 0x445   : > { %v881_v55 = vpop.f32.mrb[18].mxu0 }
 0x446   : > { %887 = vrot.lane.b32.xlu1 %v885_v53, %s1626_s11  ;;  %v1270_v56 = vpop.f32.mrb[19].mxu0 }
 0x44b   : > { %v994_v58 = vpop.f32.mrb[20].mxu0 }
 0x44c   : > { %v1001_v59 = vmul.f32 %v1407_v57, %v994_v58  ;;  %v1281_v60 = vpop.f32.mrb[21].mxu0 }
 0x44d   : > { %v997_v61 = vpop.f32.mrb[22].mxu0 }
 0x44e   : > { %1003 = vrot.lane.b32.xlu1 %v1001_v59, %s1627_s14  ;;  %v1282_v62 = vpop.f32.mrb[23].mxu0 }
 0x4a9   : > { %v772_v63 = vpop.permute.xlu0 %771 }
 0x4aa   : > { %775 = vst.msk [vmem:[#allocation4] sm:$0xff] %vm774_vm6, %v772_v63 }
 0x4b8   : > { %v888_v1 = vpop.permute.xlu1 %887 }
 0x4b9   : > { %891 = vst.msk [vmem:[#allocation4] sm:$0xff] %vm890_vm7, %v888_v1 }
 0x4c0   : > { %v1004_v2 = vpop.permute.xlu1 %1003 }
 0x4c1   : > { %1007 = vst.msk [vmem:[#allocation4] sm:$0xff] %vm1006_vm8, %v1004_v2 }
 0x4c8   : > { %v1008_v3 = vld [vmem:[#allocation4] sm:$0xff] }
 0x4c9   : > { %1010 = vst.msk [vmem:[%s308_s17] sm:$0xff] %vm1009_vm9, %v1008_v3 }
 0x4ca   : > { %1535 = shalt.err (!%p1532_p4)
}
 0x4cb   : > { %s1536_s10 = scalar_lea.hbm %s1987_s26, 128  ;;  %s1540_s7 = scalar_lea.hbm %s2041_s5, 256 }
 0x4cc   : > { %p1537_p2 = scmp.ne.s32.totalorder %s1987_s26, %s1536_s10  ;;  %p1541_p12 = scmp.lt.u32.totalorder %s1987_s26, %s2041_s5 }
 0x4cd   : > { %p1542_p11 = scmp.lt.u32.totalorder %s1540_s7, %s1536_s10  ;;  %p1544_p6 = scmp.lt.u32.totalorder %s1536_s10, %s1987_s26 }
 0x4ce   : > { %p1538_p8 = pnand %p1537_p2, %p1819_p10 }
 0x4cf   : > { %p1543_p13 = por %p1542_p11, %p1541_p12 }
 0x4d0   : > { %p1539_p1 = pneg %p1538_p8 }
 0x4d1   : > { %p1545_p3 = por %p1544_p6, %p1543_p13 }
 0x4d3   : > { %p1546_p5 = pnand %p1545_p3, %p1539_p1 }
 0x4d5   : > { %1549 = shalt.err (!%p1546_p5)
}
 0x4d6   : > { %1297 = dma.vmem_to_hbm [thread:$0]  (%p1819_p10), %s1989_s25, 128, %s1987_s26, %s1012_s28  }
 0x4d7 PF: > { %s2063_s14 = sld [smem:[#allocation18_spill]]  ;;  %s2064_s16 = sld [smem:[#allocation19_spill]] }
 0x4d8   : > { %p2066_p9 = scmp.ge.s32.totalorder %s1612_s23, 2 }
 0x4dd   : > { %s1038_s17 = sand.u32 1, %s2063_s14   ;;  %p2065_p7 = scmp.ne.s32.totalorder %s2064_s16, 0 }
 0x4de   : > { %s1039_s24 = scalar_lea.sflag [#allocation7], %s1038_s17 }
 0x4df   : > { %p1314_p0 = pnand %p2066_p9, %p2065_p7 }
 0x4e1   : > { %1587 = dma.done.wait (!%p1314_p0), %s1039_s24, 128  }
 0x4e2   : > { %1589 = vsyncadd (!%p1314_p0), %s1039_s24, 4294967168  ;;  %s23_s23 = sadd.s32 1, %s1612_s23   ;;  %s2067_s18 = smov %s1596_s19 }
 0x4e3   : > { %p20_p4 = scmp.ge.s32.totalorder %s23_s23, 4   ;;  %s2068_s19 = smov %s1600_s20 }
 0x4e4   : > { %s2069_s20 = smov %s1831_s13  ;;  %s2070_s21 = smov %s1608_s22 }
 0x4e5   : > { %s2071_s22 = smov %s2073_s8  ;;  %22 = sbr.rel (!%p20_p4) target bundleno = 8 (0x8), region = 117 }
 0x4ec   :  { %1044 = vsyncpa [#allocation6], 1 }
 0x4ed   :  { %1046 = vsyncpa [#allocation6 + $0x1], 1 }
 0x4ee   :  { %1047 = vsyncpa [#allocation9], 1 }
 0x4ef   :  { %1048 = vsyncpa [#allocation12], 1 }
 0x4f0   :  { %1049 = vsyncpa [#allocation7], 1 }
 0x4f1   :  { %1051 = vsyncpa [#allocation7 + $0x1], 1 }

</bundles_post_ra>
